<compile_context>
chip_gen: v6e
topology: v6e:2x2x1
jax: 0.10.0
libtpu: 0.0.40
codegen_flags: <defaults>
</compile_context>

<pallas_src>
import functools

import jax
import jax.numpy as jnp
from jax import lax
from jax.experimental import pallas as pl
from jax.experimental.pallas import tpu as pltpu


def _round_up(x, m):
    return (x + m - 1) // m * m


def _critic_kernel(x_ref, w1_ref, b1_ref, w2_ref, b2_ref, w3t_ref, b3_ref, out_ref):
    # One batch tile of the fused 3-layer MLP.  MXU matmuls accumulate in f32;
    # bias adds and tanh are done in f32 (safe on v5e, which has no bf16 VPU/EUP).
    x = x_ref[...]
    h1 = jnp.tanh(
        jnp.dot(x, w1_ref[...], preferred_element_type=jnp.float32) + b1_ref[...])
    h2 = jnp.tanh(
        jnp.dot(h1.astype(w2_ref.dtype), w2_ref[...],
                preferred_element_type=jnp.float32) + b2_ref[...])
    # Final layer computed transposed: (1, H2) x (TILE_B, H2)^T -> (1, TILE_B).
    # Batch ends up on the lane axis, so the store below is lane-dense/unmasked.
    v_t = lax.dot_general(
        w3t_ref[...], h2.astype(w3t_ref.dtype),
        dimension_numbers=(((1,), (1,)), ((), ())),
        preferred_element_type=jnp.float32)
    out_ref[...] = (v_t + b3_ref[0, 0]).astype(out_ref.dtype)


@functools.partial(jax.jit, static_argnames=("tile_b", "compute_dtype"))
def critic_forward(state, w1, b1, w2, b2, w3, b3, *, tile_b=512,
                   compute_dtype=jnp.float32):
    """CriticNetwork.forward: returns value of shape (B, 1), float32.

    Weights use the (in_features, out_features) layout (transpose of
    torch.nn.Linear.weight); biases are (1, out_features); b3 is (1, 1).
    `compute_dtype=jnp.bfloat16` halves HBM traffic on v6e/v7x (f32 accumulation
    is kept, so accuracy stays close to the f32 reference).
    """
    B, in_dim = state.shape
    h1_dim = w1.shape[1]
    h2_dim = w2.shape[1]
    f32 = jnp.float32

    # Pad hidden widths to the 128-lane vreg width (zero padding is exact).
    h1p = _round_up(h1_dim, 128)
    h2p = _round_up(h2_dim, 128)

    # Batch tile: multiple of 128 so the transposed output block is lane-dense.
    tile_b = min(tile_b, _round_up(B, 128))
    tile_b = _round_up(tile_b, 128)
    b_pad = _round_up(B, tile_b)
    num_tiles = b_pad // tile_b

    state_p = jnp.zeros((b_pad, in_dim), compute_dtype).at[:B].set(
        state.astype(compute_dtype))
    w1_p = jnp.zeros((in_dim, h1p), compute_dtype).at[:, :h1_dim].set(
        w1.astype(compute_dtype))
    b1_p = jnp.zeros((1, h1p), f32).at[:, :h1_dim].set(b1.astype(f32))
    w2_p = jnp.zeros((h1p, h2p), compute_dtype).at[:h1_dim, :h2_dim].set(
        w2.astype(compute_dtype))
    b2_p = jnp.zeros((1, h2p), f32).at[:, :h2_dim].set(b2.astype(f32))
    # Last layer stored transposed as a (1, h2p) row.
    w3t_p = jnp.zeros((1, h2p), compute_dtype).at[:, :h2_dim].set(
        w3.reshape(1, h2_dim).astype(compute_dtype))
    b3_s = b3.reshape(1, 1).astype(f32)

    const = lambda i: (0, 0)  # weights: same block every step -> VMEM resident
    out_t = pl.pallas_call(
        _critic_kernel,
        grid=(num_tiles,),
        in_specs=[
            pl.BlockSpec((tile_b, in_dim), lambda i: (i, 0)),   # state tile
            pl.BlockSpec((in_dim, h1p), const),                 # w1
            pl.BlockSpec((1, h1p), const),                      # b1
            pl.BlockSpec((h1p, h2p), const),                    # w2
            pl.BlockSpec((1, h2p), const),                      # b2
            pl.BlockSpec((1, h2p), const),                      # w3 (transposed)
            pl.BlockSpec(memory_space=pltpu.MemorySpace.SMEM),  # b3 scalar
        ],
        out_specs=pl.BlockSpec((1, tile_b), lambda i: (0, i)),
        out_shape=jax.ShapeDtypeStruct((1, b_pad), f32),
        compiler_params=pltpu.CompilerParams(
            dimension_semantics=("parallel",)),
    )(state_p, w1_p, b1_p, w2_p, b2_p, w3t_p, b3_s)

    # (1, B_pad) row -> (B, 1) column; pure layout plumbing in the wrapper.
    return out_t[0, :B, None]


def init_linear(key, fan_in, fan_out):
    # Deterministic init mimicking torch.nn.Linear default (uniform +-1/sqrt(fan_in)).
    kw, kb = jax.random.split(key)
    bound = 1.0 / jnp.sqrt(jnp.float32(fan_in))
    w = jax.random.uniform(kw, (fan_in, fan_out), jnp.float32, -bound, bound)
    b = jax.random.uniform(kb, (1, fan_out), jnp.float32, -bound, bound)
    return w, b


# TODO(synk): the Adam optimizer / .to(device) in the PyTorch module are training
# setup, not part of forward, and are intentionally not translated.

if __name__ == "__main__":
    # Small shapes consistent with the module: input_dim=32, hl1=hl2=64.
    # B=300 with tile_b=128 exercises a multi-step grid plus batch padding.
    B, input_dim, hl1_dim, hl2_dim = 300, 32, 64, 64

    key = jax.random.PRNGKey(0)
    k_state, k1, k2, k3 = jax.random.split(key, 4)

    state = jax.random.normal(k_state, (B, input_dim), jnp.float32)
    w1, b1 = init_linear(k1, input_dim, hl1_dim)
    w2, b2 = init_linear(k2, hl1_dim, hl2_dim)
    w3, b3 = init_linear(k3, hl2_dim, 1)

    # f32 path: exact parity with the PyTorch module.
    value = critic_forward(state, w1, b1, w2, b2, w3, b3, tile_b=128)
    value = jax.block_until_ready(value)

    # Pure-JAX reference.
    ref = jnp.tanh(state @ w1 + b1)
    ref = jnp.tanh(ref @ w2 + b2)
    ref = ref @ w3 + b3

    assert value.shape == (B, 1), value.shape
    assert jnp.allclose(value, ref, atol=1e-5, rtol=1e-5), (
        float(jnp.max(jnp.abs(value - ref))))

    # bf16 compute path (HBM-bandwidth lever for v6e/v7x); looser tolerance.
    value_bf16 = critic_forward(state, w1, b1, w2, b2, w3, b3, tile_b=128,
                                compute_dtype=jnp.bfloat16)
    value_bf16 = jax.block_until_ready(value_bf16)
    assert value_bf16.shape == (B, 1), value_bf16.shape
    assert jnp.allclose(value_bf16, ref, atol=5e-2, rtol=5e-2), (
        float(jnp.max(jnp.abs(value_bf16 - ref))))

    print("KERNEL_OK")
</pallas_src>

<mosaic_0001>
module attributes {stable_mosaic.version = 11 : i64} {
  func.func @_critic_kernel(%arg0: i32, %arg1: memref<128x32xf32, #tpu.memory_space<vmem>>, %arg2: memref<32x128xf32, #tpu.memory_space<vmem>>, %arg3: memref<1x128xf32, #tpu.memory_space<vmem>>, %arg4: memref<128x128xf32, #tpu.memory_space<vmem>>, %arg5: memref<1x128xf32, #tpu.memory_space<vmem>>, %arg6: memref<1x128xf32, #tpu.memory_space<vmem>>, %arg7: memref<1x1xf32, #tpu.memory_space<smem>>, %arg8: memref<1x128xf32, #tpu.memory_space<vmem>>) attributes {dimension_semantics = [#tpu.dimension_semantics<parallel>], iteration_bounds = array<i64: 3>, scalar_prefetch = 0 : i64, scratch_operands = 0 : i64, tpu.core_type = #tpu.core_type<tc>, window_params = [{transform_indices = @transform_0, window_bounds = array<i64: 128, 32>}, {pipeline_mode = #tpu.pipeline_mode<synchronous>, transform_indices = @transform_1, window_bounds = array<i64: 32, 128>}, {pipeline_mode = #tpu.pipeline_mode<synchronous>, transform_indices = @transform_2, window_bounds = array<i64: 1, 128>}, {pipeline_mode = #tpu.pipeline_mode<synchronous>, transform_indices = @transform_3, window_bounds = array<i64: 128, 128>}, {pipeline_mode = #tpu.pipeline_mode<synchronous>, transform_indices = @transform_4, window_bounds = array<i64: 1, 128>}, {pipeline_mode = #tpu.pipeline_mode<synchronous>, transform_indices = @transform_5, window_bounds = array<i64: 1, 128>}, {transform_indices = @transform_6, window_bounds = array<i64: 1, 1>}, {transform_indices = @transform_7, window_bounds = array<i64: 1, 128>}]} {
    %c0 = arith.constant 0 : index
    %c0_0 = arith.constant 0 : index
    %0 = vector.load %arg1[%c0, %c0_0] : memref<128x32xf32, #tpu.memory_space<vmem>>, vector<128x32xf32>
    %c0_1 = arith.constant 0 : index
    %c0_2 = arith.constant 0 : index
    %1 = vector.load %arg2[%c0_1, %c0_2] : memref<32x128xf32, #tpu.memory_space<vmem>>, vector<32x128xf32>
    %cst = arith.constant dense<0.000000e+00> : vector<128x128xf32>
    %2 = tpu.matmul %0, %1, %cst {dimension_numbers = #tpu.dot_dimension_numbers<[1], [0], [0], [1], [0, 0, 1, 1], [], []>} : vector<128x32xf32>, vector<32x128xf32>, vector<128x128xf32> -> vector<128x128xf32>
    %c0_3 = arith.constant 0 : index
    %c0_4 = arith.constant 0 : index
    %3 = vector.load %arg3[%c0_3, %c0_4] : memref<1x128xf32, #tpu.memory_space<vmem>>, vector<1x128xf32>
    %4 = vector.broadcast %3 : vector<1x128xf32> to vector<128x128xf32>
    %5 = arith.addf %2, %4 : vector<128x128xf32>
    %6 = math.tanh %5 : vector<128x128xf32>
    %c0_5 = arith.constant 0 : index
    %c0_6 = arith.constant 0 : index
    %7 = vector.load %arg4[%c0_5, %c0_6] : memref<128x128xf32, #tpu.memory_space<vmem>>, vector<128x128xf32>
    %cst_7 = arith.constant dense<0.000000e+00> : vector<128x128xf32>
    %8 = tpu.matmul %6, %7, %cst_7 {dimension_numbers = #tpu.dot_dimension_numbers<[1], [0], [0], [1], [0, 0, 1, 1], [], []>} : vector<128x128xf32>, vector<128x128xf32>, vector<128x128xf32> -> vector<128x128xf32>
    %c0_8 = arith.constant 0 : index
    %c0_9 = arith.constant 0 : index
    %9 = vector.load %arg5[%c0_8, %c0_9] : memref<1x128xf32, #tpu.memory_space<vmem>>, vector<1x128xf32>
    %10 = vector.broadcast %9 : vector<1x128xf32> to vector<128x128xf32>
    %11 = arith.addf %8, %10 : vector<128x128xf32>
    %12 = math.tanh %11 : vector<128x128xf32>
    %c0_10 = arith.constant 0 : index
    %c0_11 = arith.constant 0 : index
    %13 = vector.load %arg6[%c0_10, %c0_11] : memref<1x128xf32, #tpu.memory_space<vmem>>, vector<1x128xf32>
    %cst_12 = arith.constant dense<0.000000e+00> : vector<1x128xf32>
    %14 = tpu.matmul %13, %12, %cst_12 {dimension_numbers = #tpu.dot_dimension_numbers<[1], [1], [0], [0], [0, 0, 1, 0], [], []>} : vector<1x128xf32>, vector<128x128xf32>, vector<1x128xf32> -> vector<1x128xf32>
    %c0_13 = arith.constant 0 : index
    %c0_14 = arith.constant 0 : index
    %15 = memref.load %arg7[%c0_13, %c0_14] : memref<1x1xf32, #tpu.memory_space<smem>>
    %16 = vector.broadcast %15 : f32 to vector<1x128xf32>
    %17 = arith.addf %14, %16 : vector<1x128xf32>
    %c0_15 = arith.constant 0 : index
    %c0_16 = arith.constant 0 : index
    %18 = vector.load %arg8[%c0_15, %c0_16] : memref<1x128xf32, #tpu.memory_space<vmem>>, vector<1x128xf32>
    tpu.vector_store %arg8[%c0_15, %c0_16], %17 {strides = array<i32>} : memref<1x128xf32, #tpu.memory_space<vmem>>, vector<1x128xf32>,
    return
  }
  func.func @transform_0(%arg0: i32) -> (i32, i32) {
    %c0_i32 = arith.constant 0 : i32
    %c0_i32_0 = arith.constant 0 : i32
    return %arg0, %c0_i32 : i32, i32
  }
  func.func @transform_1(%arg0: i32) -> (i32, i32) {
    %c0_i32 = arith.constant 0 : i32
    %c0_i32_0 = arith.constant 0 : i32
    %c0_i32_1 = arith.constant 0 : i32
    return %c0_i32, %c0_i32_0 : i32, i32
  }
  func.func @transform_2(%arg0: i32) -> (i32, i32) {
    %c0_i32 = arith.constant 0 : i32
    %c0_i32_0 = arith.constant 0 : i32
    %c0_i32_1 = arith.constant 0 : i32
    return %c0_i32, %c0_i32_0 : i32, i32
  }
  func.func @transform_3(%arg0: i32) -> (i32, i32) {
    %c0_i32 = arith.constant 0 : i32
    %c0_i32_0 = arith.constant 0 : i32
    %c0_i32_1 = arith.constant 0 : i32
    return %c0_i32, %c0_i32_0 : i32, i32
  }
  func.func @transform_4(%arg0: i32) -> (i32, i32) {
    %c0_i32 = arith.constant 0 : i32
    %c0_i32_0 = arith.constant 0 : i32
    %c0_i32_1 = arith.constant 0 : i32
    return %c0_i32, %c0_i32_0 : i32, i32
  }
  func.func @transform_5(%arg0: i32) -> (i32, i32) {
    %c0_i32 = arith.constant 0 : i32
    %c0_i32_0 = arith.constant 0 : i32
    %c0_i32_1 = arith.constant 0 : i32
    return %c0_i32, %c0_i32_0 : i32, i32
  }
  func.func @transform_6(%arg0: i32) -> (i32, i32) {
    %c0_i32 = arith.constant 0 : i32
    %c0_i32_0 = arith.constant 0 : i32
    %c0_i32_1 = arith.constant 0 : i32
    return %c0_i32, %c0_i32_0 : i32, i32
  }
  func.func @transform_7(%arg0: i32) -> (i32, i32) {
    %c0_i32 = arith.constant 0 : i32
    %c0_i32_0 = arith.constant 0 : i32
    return %c0_i32, %arg0 : i32, i32
  }
}

</mosaic_0001>

<bundles_post_ra>
// kernel: critic_forward.1
= control target key start
LH: loop header
LB: loop body
LE: loop exit
PB: predicated region body
PF: predicated region fallthrough
CT: control target
= control target key end

     0   :  { %s1166_s26 = smov 0   ;;  %s1335_s0 = inlined_call_operand.vmem [shape: f32[384,32], index: 0, kind: input, shape index: {}]   ;;  %s1336_s1 = inlined_call_operand.vmem [shape: f32[32,128], index: 1, kind: input, shape index: {}]   ;;  %s1337_s2 = inlined_call_operand.vmem [shape: f32[1,128], index: 2, kind: input, shape index: {}]   ;;  %s1338_s3 = inlined_call_operand.vmem [shape: f32[128,128], index: 3, kind: input, shape index: {}]   ;;  %s1339_s4 = inlined_call_operand.vmem [shape: f32[1,128], index: 4, kind: input, shape index: {}]   ;;  %s1340_s5 = inlined_call_operand.vmem [shape: f32[1,128], index: 5, kind: input, shape index: {}]   ;;  %s1341_s6 = inlined_call_operand.<no memory space> [shape: f32[1,1], index: 6, kind: input, shape index: {}]   ;;  %s1342_s7 = inlined_call_operand.vmem [shape: f32[1,384], index: 7, kind: output, shape index: {}]  }
   0x1   :  { %12 = sst [smem:[#allocation2]] %s1341_s6 }
   0x2 LB: > { %s1172_s27 = sadd.s32 4294967295, %s1119_s26   ;;  %p824_p0 = scmp.ge.s32.totalorder %s1119_s26, 1  ;;  %s1119_s26 = sphi %s1166_s26, %s18_s26  }
   0x3   : > { %p239_p1 = scmp.lt.s32.totalorder %s1119_s26, 4 }
   0x5   : > { %p240_p2 = pnand %p824_p0, %p239_p1 }
   0x6   : > { %s825_s8 = sshll.u32 (!%p240_p2), %s1172_s27, 4  ;;  %s700_s11 = sld [smem:[#allocation2]] (!%p240_p2) }
   0x7   : > { %243 = sbr.rel (%p240_p2) target bundleno = 729 (0x2d9), region = 48  ;;  %p270_p3 = scmp.lt.s32.totalorder (!%p240_p2), %s825_s8, 47 }
   0x8   : > { %p275_p4 = scmp.lt.s32.totalorder (!%p240_p2), %s1172_s27, 2 }
   0xc   : > { %v297_v0 = vld [vmem:[%s1336_s1 + $0x18] sm:$0xff]  ;;  %v296_v1 = vld [vmem:[%s1336_s1 + $0x10] sm:$0xff]  ;;  %v295_v2 = vld [vmem:[%s1336_s1 + $0x8] sm:$0xff]  ;;  %s1344_s8 = smov (!%p270_p3, %s825_s8), 47  ;;  %vm305_vm0 = vcmask 261120   ;;  %vm1122_vm1 = vmmov 0  }
   0xd   : > { %916 = vmatprep.subr.mxu1 %v297_v0  ;;  %v294_v3 = vld [vmem:[%s1336_s1] sm:$0xff]  ;;  %s826_s13 = sshll.u32 %s1344_s8, 3  ;;  %v530_v4 = vld [vmem:[%s1338_s3 + $0x78] sm:$0xff]  ;;  %v529_v8 = vld [vmem:[%s1338_s3 + $0x70] sm:$0xff]  ;;  %s1346_s27 = smov (!%p275_p4, %s1172_s27), 2 }
   0xe   : > { %917 = vmatpush3.msra.mxu1 %v297_v0  ;;  %s1192_s16 = scalar_lea.vmem %s1335_s0, %s826_s13  ;;  %v528_v10 = vld [vmem:[%s1338_s3 + $0x68] sm:$0xff]  ;;  %v527_v12 = vld [vmem:[%s1338_s3 + $0x60] sm:$0xff]  ;;  %v526_v14 = vld [vmem:[%s1338_s3 + $0x58] sm:$0xff]  ;;  %s277_s14 = scalar_lea.vmem %s1342_s7, %s1346_s27 }
   0xf   : > { %918 = vmatprep.subr.mxu1 %v296_v1  ;;  %v278_v5 = vld [vmem:[%s1192_s16] sm:$0xff]  ;;  %v279_v6 = vld [vmem:[%s1192_s16 + $0x8] sm:$0xff]  ;;  %v280_v7 = vld [vmem:[%s1192_s16 + $0x10] sm:$0xff] }
  0x10   : > { %919 = vmatpush3.msra.mxu1 %v296_v1  ;;  %924 = vmatprep.mubr.msk.f32.mxu1 %vm305_vm0, %v278_v5  ;;  %v281_v9 = vld [vmem:[%s1192_s16 + $0x18] sm:$0xff]  ;;  %v282_v11 = vld [vmem:[%s1192_s16 + $0x20] sm:$0xff]  ;;  %v283_v13 = vld [vmem:[%s1192_s16 + $0x28] sm:$0xff] }
  0x11   : > { %920 = vmatprep.subr.mxu1 %v295_v2  ;;  %v284_v15 = vld [vmem:[%s1192_s16 + $0x30] sm:$0xff]  ;;  %v285_v17 = vld [vmem:[%s1192_s16 + $0x38] sm:$0xff]  ;;  %v524_v18 = vld [vmem:[%s1338_s3 + $0x48] sm:$0xff] }
  0x12   : > { %921 = vmatpush3.msra.mxu1 %v295_v2  ;;  %v525_v16 = vld [vmem:[%s1338_s3 + $0x50] sm:$0xff]  ;;  %v286_v19 = vld [vmem:[%s1192_s16 + $0x40] sm:$0xff]  ;;  %v287_v20 = vld [vmem:[%s1192_s16 + $0x48] sm:$0xff] }
  0x13   : > { %922 = vmatprep.subr.mxu1 %v294_v3  ;;  %v288_v21 = vld [vmem:[%s1192_s16 + $0x50] sm:$0xff]  ;;  %v289_v22 = vld [vmem:[%s1192_s16 + $0x58] sm:$0xff]  ;;  %v290_v23 = vld [vmem:[%s1192_s16 + $0x60] sm:$0xff] }
  0x14   : > { %923 = vmatpush3.msra.mxu1 %v294_v3  ;;  %v291_v24 = vld [vmem:[%s1192_s16 + $0x68] sm:$0xff]  ;;  %v292_v25 = vld [vmem:[%s1192_s16 + $0x70] sm:$0xff]  ;;  %v293_v26 = vld [vmem:[%s1192_s16 + $0x78] sm:$0xff] }
  0x15   : > { %925 = vmatmul.mubr.msk.f32.vlgmr.msra.gmra.mxu1 %vm305_vm0, %v279_v6  ;;  %948 = vmatprep.subr.mxu1 %v530_v4  ;;  %v523_v27 = vld [vmem:[%s1338_s3 + $0x40] sm:$0xff]  ;;  %v522_v28 = vld [vmem:[%s1338_s3 + $0x38] sm:$0xff]  ;;  %v521_v29 = vld [vmem:[%s1338_s3 + $0x30] sm:$0xff] }
  0x16   : > { %927 = vmatprep.mubr.msk.f32.mxu1 %vm305_vm0, %v280_v7  ;;  %949 = vmatpush3.msra.mxu1 %v530_v4  ;;  %v520_v30 = vld [vmem:[%s1338_s3 + $0x28] sm:$0xff]  ;;  %v519_v31 = vld [vmem:[%s1338_s3 + $0x20] sm:$0xff]  ;;  %v518_v32 = vld [vmem:[%s1338_s3 + $0x18] sm:$0xff] }
  0x17   : > { %950 = vmatprep.subr.mxu1 %v529_v8  ;;  %v517_v33 = vld [vmem:[%s1338_s3 + $0x10] sm:$0xff]  ;;  %v516_v34 = vld [vmem:[%s1338_s3 + $0x8] sm:$0xff]  ;;  %v515_v35 = vld [vmem:[%s1338_s3] sm:$0xff] }
  0x18   : > { %951 = vmatpush3.msra.mxu1 %v529_v8  ;;  %v827_v36 = vld [vmem:[%s1337_s2] ss:$0 sm:$0xff] }
  0x19   : > { %928 = vmatmul.mubr.msk.f32.gmra.mxu1 %vm305_vm0, %v281_v9  ;;  %952 = vmatprep.subr.mxu1 %v528_v10 }
  0x1a   : > { %930 = vmatprep.mubr.msk.f32.mxu1 %vm305_vm0, %v282_v11  ;;  %953 = vmatpush3.msra.mxu1 %v528_v10 }
  0x1b   : > { %954 = vmatprep.subr.mxu1 %v527_v12 }
  0x1c   : > { %955 = vmatpush3.msra.mxu1 %v527_v12 }
  0x1d   : > { %931 = vmatmul.mubr.msk.f32.gmra.mxu1 %vm305_vm0, %v283_v13  ;;  %956 = vmatprep.subr.mxu1 %v526_v14 }
  0x1e   : > { %933 = vmatprep.mubr.msk.f32.mxu1 %vm305_vm0, %v284_v15  ;;  %957 = vmatpush3.msra.mxu1 %v526_v14 }
  0x1f   : > { %958 = vmatprep.subr.mxu1 %v525_v16 }
  0x20   : > { %959 = vmatpush3.msra.mxu1 %v525_v16 }
  0x21   : > { %934 = vmatmul.mubr.msk.f32.gmra.mxu1 %vm305_vm0, %v285_v17  ;;  %960 = vmatprep.subr.mxu1 %v524_v18 }
  0x22   : > { %936 = vmatprep.mubr.msk.f32.mxu1 %vm305_vm0, %v286_v19  ;;  %961 = vmatpush3.msra.mxu1 %v524_v18 }
  0x23   : > { %962 = vmatprep.subr.mxu1 %v523_v27 }
  0x24   : > { %963 = vmatpush3.msra.mxu1 %v523_v27 }
  0x25   : > { %937 = vmatmul.mubr.msk.f32.gmra.mxu1 %vm305_vm0, %v287_v20  ;;  %964 = vmatprep.subr.mxu1 %v522_v28 }
  0x26   : > { %939 = vmatprep.mubr.msk.f32.mxu1 %vm305_vm0, %v288_v21  ;;  %965 = vmatpush3.msra.mxu1 %v522_v28  ;;  %v1121_v21 = vmov 0.0  }
  0x27   : > { %966 = vmatprep.subr.mxu1 %v521_v29  ;;  %1004 = vmatprep.subr.mxu0 %v1121_v21 }
  0x28   : > { %967 = vmatpush3.msra.mxu1 %v521_v29  ;;  %1036 = vmatprep.mubr.msk.f32.mxu0 %vm1122_vm1, %v1121_v21 }
  0x29   : > { %940 = vmatmul.mubr.msk.f32.gmra.mxu1 %vm305_vm0, %v289_v22  ;;  %968 = vmatprep.subr.mxu1 %v520_v30 }
  0x2a   : > { %942 = vmatprep.mubr.msk.f32.mxu1 %vm305_vm0, %v290_v23  ;;  %969 = vmatpush3.msra.mxu1 %v520_v30 }
  0x2b   : > { %970 = vmatprep.subr.mxu1 %v519_v31 }
  0x2c   : > { %971 = vmatpush3.msra.mxu1 %v519_v31 }
  0x2d   : > { %943 = vmatmul.mubr.msk.f32.gmra.mxu1 %vm305_vm0, %v291_v24  ;;  %972 = vmatprep.subr.mxu1 %v518_v32 }
  0x2e   : > { %945 = vmatprep.mubr.msk.f32.mxu1 %vm305_vm0, %v292_v25  ;;  %973 = vmatpush3.msra.mxu1 %v518_v32 }
  0x2f   : > { %974 = vmatprep.subr.mxu1 %v517_v33 }
  0x30   : > { %975 = vmatpush3.msra.mxu1 %v517_v33 }
  0x31   : > { %946 = vmatmul.mubr.msk.f32.gmra.mxu1 %vm305_vm0, %v293_v26  ;;  %976 = vmatprep.subr.mxu1 %v516_v34 }
  0x32   : > { %977 = vmatpush3.msra.mxu1 %v516_v34 }
  0x33   : > { %978 = vmatprep.subr.mxu1 %v515_v35 }
  0x34   : > { %979 = vmatpush3.msra.mxu1 %v515_v35 }
  0xd5   : > { %v926_v37 = vpop.f32.mrf.mxu1 }
  0xd6   : > { %v426_v38 = vadd.f32 %v926_v37, %v827_v36 }
  0xd7   : > { %v420_v39 = vpop.f32.mrf.mxu1 }
  0xd8   : > { %v421_v40 = vadd.f32 %v827_v36, %v420_v39 }
  0xd9   : > { %v929_v41 = vpop.f32.mrf.mxu1 }
  0xda   : > { %1049 = vtanh.f32 %v421_v40  ;;  %v436_v42 = vadd.f32 %v929_v41, %v827_v36 }
  0xdb   : > { %1051 = vtanh.f32 %v426_v38  ;;  %v430_v43 = vpop.f32.mrf.mxu1 }
  0xdc   : > { %v431_v44 = vadd.f32 %v827_v36, %v430_v43 }
  0xdd   : > { %v932_v45 = vpop.f32.mrf.mxu1 }
  0xde   : > { %1053 = vtanh.f32 %v431_v44  ;;  %v446_v46 = vadd.f32 %v932_v45, %v827_v36 }
  0xdf   : > { %1055 = vtanh.f32 %v436_v42  ;;  %v440_v47 = vpop.f32.mrf.mxu1 }
  0xe0   : > { %v441_v48 = vadd.f32 %v827_v36, %v440_v47 }
  0xe1   : > { %v935_v49 = vpop.f32.mrf.mxu1 }
  0xe2   : > { %1057 = vtanh.f32 %v441_v48  ;;  %v456_v50 = vadd.f32 %v935_v49, %v827_v36 }
  0xe3   : > { %1059 = vtanh.f32 %v446_v46  ;;  %v450_v51 = vpop.f32.mrf.mxu1 }
  0xe4   : > { %v451_v52 = vadd.f32 %v827_v36, %v450_v51 }
  0xe5   : > { %v938_v53 = vpop.f32.mrf.mxu1 }
  0xe6   : > { %1061 = vtanh.f32 %v451_v52  ;;  %v466_v55 = vadd.f32 %v938_v53, %v827_v36 }
  0xe7   : > { %v1050_v54 = vpop.eup %1049  ;;  %1063 = vtanh.f32 %v456_v50  ;;  %v460_v56 = vpop.f32.mrf.mxu1 }
  0xe8   : > { %v1052_v57 = vpop.eup %1051  ;;  %v461_v58 = vadd.f32 %v827_v36, %v460_v56  ;;  %980 = vmatprep.mubr.f32.mxu1 %v1050_v54 }
  0xe9   : > { %v941_v59 = vpop.f32.mrf.mxu1  ;;  %981 = vmatmul.mubr.f32.vlgmr.msra.gmra.mxu1 %v1052_v57 }
  0xea   : > { %1065 = vtanh.f32 %v461_v58  ;;  %v476_v61 = vadd.f32 %v941_v59, %v827_v36 }
  0xeb   : > { %v1054_v60 = vpop.eup %1053  ;;  %1067 = vtanh.f32 %v466_v55  ;;  %v470_v62 = vpop.f32.mrf.mxu1 }
  0xec   : > { %v1056_v63 = vpop.eup %1055  ;;  %v471_v0 = vadd.f32 %v827_v36, %v470_v62  ;;  %983 = vmatprep.mubr.f32.mxu1 %v1054_v60 }
  0xed   : > { %v944_v1 = vpop.f32.mrf.mxu1  ;;  %984 = vmatmul.mubr.f32.gmra.mxu1 %v1056_v63 }
  0xee   : > { %1069 = vtanh.f32 %v471_v0  ;;  %v486_v3 = vadd.f32 %v944_v1, %v827_v36 }
  0xef   : > { %v1058_v2 = vpop.eup %1057  ;;  %1071 = vtanh.f32 %v476_v61  ;;  %v480_v4 = vpop.f32.mrf.mxu1 }
  0xf0   : > { %v1060_v5 = vpop.eup %1059  ;;  %v481_v6 = vadd.f32 %v827_v36, %v480_v4  ;;  %986 = vmatprep.mubr.f32.mxu1 %v1058_v2 }
  0xf1   : > { %v947_v7 = vpop.f32.mrf.mxu1  ;;  %987 = vmatmul.mubr.f32.gmra.mxu1 %v1060_v5 }
  0xf2   : > { %1073 = vtanh.f32 %v481_v6  ;;  %v496_v9 = vadd.f32 %v947_v7, %v827_v36  ;;  %v699_v7 = vld [vmem:[%s1340_s5] sm:$0x1] }
  0xf3   : > { %v1062_v8 = vpop.eup %1061  ;;  %1075 = vtanh.f32 %v486_v3  ;;  %v490_v10 = vpop.f32.mrf.mxu1 }
  0xf4   : > { %v1064_v11 = vpop.eup %1063  ;;  %v491_v12 = vadd.f32 %v827_v36, %v490_v10  ;;  %989 = vmatprep.mubr.f32.mxu1 %v1062_v8  ;;  %v1288_v36 = vld [vmem:[%s1339_s4] ss:$0 sm:$0xff]  ;;  %v701_v8 = vstv %s700_s11 }
  0xf5   : > { %990 = vmatmul.mubr.f32.gmra.mxu1 %v1064_v11 }
  0xf6   : > { %1077 = vtanh.f32 %v491_v12 }
  0xf7   : > { %v1066_v13 = vpop.eup %1065  ;;  %1079 = vtanh.f32 %v496_v9 }
  0xf8   : > { %v1068_v14 = vpop.eup %1067  ;;  %992 = vmatprep.mubr.f32.mxu1 %v1066_v13 }
  0xf9   : > { %993 = vmatmul.mubr.f32.gmra.mxu1 %v1068_v14 }
  0xfb   : > { %v1070_v15 = vpop.eup %1069 }
  0xfc   : > { %v1072_v16 = vpop.eup %1071  ;;  %995 = vmatprep.mubr.f32.mxu1 %v1070_v15 }
  0xfd   : > { %996 = vmatmul.mubr.f32.gmra.mxu1 %v1072_v16 }
  0xff   : > { %v1074_v17 = vpop.eup %1073 }
 0x100   : > { %v1076_v18 = vpop.eup %1075  ;;  %998 = vmatprep.mubr.f32.mxu1 %v1074_v17 }
 0x101   : > { %999 = vmatmul.mubr.f32.gmra.mxu1 %v1076_v18 }
 0x103   : > { %v1078_v19 = vpop.eup %1077 }
 0x104   : > { %v1080_v20 = vpop.eup %1079  ;;  %1001 = vmatprep.mubr.f32.mxu1 %v1078_v19 }
 0x105   : > { %1002 = vmatmul.mubr.f32.gmra.mxu1 %v1080_v20 }
 0x1a9   : > { %v1279_v22 = vpop.f32.mrf.mxu1 }
 0x1aa   : > { %v610_v63 = vadd.f32 %v1279_v22, %v1288_v36 }
 0x1ab   : > { %v1281_v23 = vpop.f32.mrf.mxu1 }
 0x1ac   : > { %v605_v1 = vadd.f32 %v1288_v36, %v1281_v23 }
 0x1ad   : > { %v985_v24 = vpop.f32.mrf.mxu1 }
 0x1ae   : > { %v620_v59 = vadd.f32 %v985_v24, %v1288_v36 }
 0x1af   : > { %v1283_v25 = vpop.f32.mrf.mxu1 }
 0x1b0   : > { %v615_v61 = vadd.f32 %v1288_v36, %v1283_v25 }
 0x1b1   : > { %v988_v26 = vpop.f32.mrf.mxu1 }
 0x1b2   : > { %v630_v55 = vadd.f32 %v988_v26, %v1288_v36 }
 0x1b3   : > { %v624_v27 = vpop.f32.mrf.mxu1 }
 0x1b4   : > { %v625_v57 = vadd.f32 %v1288_v36, %v624_v27 }
 0x1b5   : > { %v991_v28 = vpop.f32.mrf.mxu1 }
 0x1b6   : > { %v640_v51 = vadd.f32 %v991_v28, %v1288_v36 }
 0x1b7   : > { %v634_v29 = vpop.f32.mrf.mxu1 }
 0x1b8   : > { %v635_v53 = vadd.f32 %v1288_v36, %v634_v29 }
 0x1b9   : > { %v994_v30 = vpop.f32.mrf.mxu1 }
 0x1ba   : > { %v650_v47 = vadd.f32 %v994_v30, %v1288_v36 }
 0x1bb   : > { %v644_v31 = vpop.f32.mrf.mxu1 }
 0x1bc   : > { %v645_v49 = vadd.f32 %v1288_v36, %v644_v31 }
 0x1bd   : > { %v997_v32 = vpop.f32.mrf.mxu1 }
 0x1be   : > { %v660_v43 = vadd.f32 %v997_v32, %v1288_v36 }
 0x1bf   : > { %v654_v33 = vpop.f32.mrf.mxu1 }
 0x1c0   : > { %v655_v45 = vadd.f32 %v1288_v36, %v654_v33 }
 0x1c1   : > { %v1000_v34 = vpop.f32.mrf.mxu1 }
 0x1c2   : > { %v670_v41 = vadd.f32 %v1000_v34, %v1288_v36 }
 0x1c3   : > { %v664_v35 = vpop.f32.mrf.mxu1 }
 0x1c4   : > { %v665_v42 = vadd.f32 %v1288_v36, %v664_v35 }
 0x1c5   : > { %v1003_v37 = vpop.f32.mrf.mxu1 }
 0x1c6   : > { %v680_v38 = vadd.f32 %v1003_v37, %v1288_v36 }
 0x1c7   : > { %v674_v39 = vpop.f32.mrf.mxu1 }
 0x1c8   : > { %1081 = vtanh.f32 %v680_v38  ;;  %v675_v40 = vadd.f32 %v1288_v36, %v674_v39 }
 0x1ca   : > { %1083 = vtanh.f32 %v675_v40 }
 0x1cb   : > { %1085 = vtanh.f32 %v670_v41 }
 0x1cc   : > { %1087 = vtanh.f32 %v665_v42 }
 0x1cd   : > { %1089 = vtanh.f32 %v660_v43 }
 0x1ce   : > { %1091 = vtanh.f32 %v655_v45 }
 0x1cf   : > { %1093 = vtanh.f32 %v650_v47 }
 0x1d0   : > { %1095 = vtanh.f32 %v645_v49 }
 0x1d1   : > { %1097 = vtanh.f32 %v640_v51 }
 0x1d2   : > { %1099 = vtanh.f32 %v635_v53 }
 0x1d3   : > { %1101 = vtanh.f32 %v630_v55 }
 0x1d4   : > { %1103 = vtanh.f32 %v625_v57 }
 0x1d5   : > { %v1082_v44 = vpop.eup %1081  ;;  %1105 = vtanh.f32 %v620_v59 }
 0x1d6   : > { %1005 = vmatpush3.xpose.msra.mxu0 %v1082_v44  ;;  %1107 = vtanh.f32 %v615_v61 }
 0x1d7   : > { %1006 = vmatprep.subr.mxu0 %v1121_v21  ;;  %v1084_v46 = vpop.eup %1083  ;;  %1109 = vtanh.f32 %v610_v63 }
 0x1d8   : > { %v1086_v48 = vpop.eup %1085  ;;  %1111 = vtanh.f32 %v605_v1 }
 0x1d9   : > { %v1088_v50 = vpop.eup %1087 }
 0x1da   : > { %1007 = vmatpush3.xpose.msra.mxu0 %v1084_v46  ;;  %v1090_v52 = vpop.eup %1089 }
 0x1db   : > { %1008 = vmatprep.subr.mxu0 %v1121_v21  ;;  %v1092_v54 = vpop.eup %1091 }
 0x1dc   : > { %v1094_v56 = vpop.eup %1093 }
 0x1dd   : > { %v1096_v58 = vpop.eup %1095 }
 0x1de   : > { %1009 = vmatpush3.xpose.msra.mxu0 %v1086_v48  ;;  %v1098_v60 = vpop.eup %1097 }
 0x1df   : > { %1010 = vmatprep.subr.mxu0 %v1121_v21  ;;  %v1100_v62 = vpop.eup %1099 }
 0x1e0   : > { %v1102_v0 = vpop.eup %1101 }
 0x1e1   : > { %v1104_v2 = vpop.eup %1103 }
 0x1e2   : > { %1011 = vmatpush3.xpose.msra.mxu0 %v1088_v50  ;;  %v1106_v3 = vpop.eup %1105 }
 0x1e3   : > { %1012 = vmatprep.subr.mxu0 %v1121_v21  ;;  %v1108_v4 = vpop.eup %1107 }
 0x1e4   : > { %v1110_v5 = vpop.eup %1109 }
 0x1e5   : > { %v1112_v6 = vpop.eup %1111 }
 0x1e6   : > { %1013 = vmatpush3.xpose.msra.mxu0 %v1090_v52 }
 0x1e7   : > { %1014 = vmatprep.subr.mxu0 %v1121_v21 }
 0x1ea   : > { %1015 = vmatpush3.xpose.msra.mxu0 %v1092_v54 }
 0x1eb   : > { %1016 = vmatprep.subr.mxu0 %v1121_v21 }
 0x1ee   : > { %1017 = vmatpush3.xpose.msra.mxu0 %v1094_v56 }
 0x1ef   : > { %1018 = vmatprep.subr.mxu0 %v1121_v21 }
 0x1f2   : > { %1019 = vmatpush3.xpose.msra.mxu0 %v1096_v58 }
 0x1f3   : > { %1020 = vmatprep.subr.mxu0 %v1121_v21 }
 0x1f6   : > { %1021 = vmatpush3.xpose.msra.mxu0 %v1098_v60 }
 0x1f7   : > { %1022 = vmatprep.subr.mxu0 %v1121_v21 }
 0x1fa   : > { %1023 = vmatpush3.xpose.msra.mxu0 %v1100_v62 }
 0x1fb   : > { %1024 = vmatprep.subr.mxu0 %v1121_v21 }
 0x1fe   : > { %1025 = vmatpush3.xpose.msra.mxu0 %v1102_v0 }
 0x1ff   : > { %1026 = vmatprep.subr.mxu0 %v1121_v21 }
 0x202   : > { %1027 = vmatpush3.xpose.msra.mxu0 %v1104_v2 }
 0x203   : > { %1028 = vmatprep.subr.mxu0 %v1121_v21 }
 0x206   : > { %1029 = vmatpush3.xpose.msra.mxu0 %v1106_v3 }
 0x207   : > { %1030 = vmatprep.subr.mxu0 %v1121_v21 }
 0x20a   : > { %1031 = vmatpush3.xpose.msra.mxu0 %v1108_v4 }
 0x20b   : > { %1032 = vmatprep.subr.mxu0 %v1121_v21 }
 0x20e   : > { %1033 = vmatpush3.xpose.msra.mxu0 %v1110_v5 }
 0x20f   : > { %1034 = vmatprep.subr.mxu0 %v1121_v21 }
 0x212   : > { %1035 = vmatpush3.xpose.msra.mxu0 %v1112_v6 }
 0x215   : > { %1037 = vmatmul.mubr.f32.vlgmr.msra.gmra.mxu0 %v699_v7 }
 0x2d5   : > { %v768_v9 = vpop.f32.mrf.mxu0 }
 0x2d6   : > { %v769_v10 = vadd.f32 %v768_v9, %v701_v8 }
 0x2d7   : > { %v1038_v11 = vpop.f32.mrf.mxu0 }
 0x2d8   : > { %772 = vst [vmem:[%s277_s14] sm:$0x1] %v769_v10 }
 0x2d9 PF: > { %s18_s26 = sadd.s32 1, %s1119_s26  }
 0x2da   : > { %p15_p5 = scmp.ge.s32.totalorder %s18_s26, 5  }
 0x2dc   :  { %17 = sbr.rel (!%p15_p5) target bundleno = 2 (0x2), region = 78 }

</bundles_post_ra>
